<compile_context>
chip_gen: v6e
topology: v6e:2x2x1
jax: 0.10.0
libtpu: 0.0.40
codegen_flags: <defaults>
</compile_context>

<pallas_src>
import jax
import jax.numpy as jnp
from jax.experimental import pallas as pl
from jax.experimental.pallas import tpu as pltpu  # noqa: F401  (kept for easy extension)


def reduce_max_kernel(x_ref, o_ref):
    # x_ref: full (B, C, H, W) block in VMEM
    # o_ref: full (B, H) block in VMEM (lane-dense 2-D slab)
    x = x_ref[...]                      # (B, C, H, W)
    mc = jnp.max(x, axis=1)             # (B, H, W)  channel max (VPU vmax)
    m = jnp.max(mc, axis=-1)            # (B, H)     lane-axis max (XLU), stays 2-D
    # x1 == x2 == channel max, so s = x1 + x2 and max_W(s) == m + m exactly.
    o_ref[...] = m + m


def reduce_max(x):
    B, C, H, W = x.shape
    # The PyTorch module reduces over dim = x.shape[0] - 1; with batch=2 that is
    # the channel axis. This kernel is written for that case only.
    assert B - 1 == 1, "kernel written for batch=2 so the reduced axis is the channel axis"

    # Single grid point: whole input in VMEM (8 KiB), whole (B, H) output out.
    out_2d = pl.pallas_call(
        reduce_max_kernel,
        out_shape=jax.ShapeDtypeStruct((B, H), x.dtype),
    )(x)

    # Restore the keepdim axis — pure layout op in XLA, free.
    return out_2d[:, :, None]   # (B, H, 1)


def reduce_max_ref(x):
    # Pure-JAX reference mirroring the PyTorch module literally.
    dim = x.shape[0] - 1
    x2 = jnp.max(x, axis=dim)
    x1 = jnp.squeeze(jnp.max(x, axis=dim, keepdims=True), axis=dim)
    s = x1 + x2
    return jnp.max(s, axis=-1, keepdims=True)


if __name__ == "__main__":
    key = jax.random.PRNGKey(0)
    x = jax.random.normal(key, (2, 4, 16, 16), dtype=jnp.float32)

    out = reduce_max(x)
    jax.block_until_ready(out)

    ref = reduce_max_ref(x)
    assert out.shape == ref.shape == (2, 16, 1), (out.shape, ref.shape)
    assert jnp.allclose(out, ref), "mismatch vs reference"

    print("KERNEL_OK")
</pallas_src>

<mosaic_0001>
module attributes {stable_mosaic.version = 11 : i64} {
  func.func @reduce_max_kernel(%arg0: memref<2x4x16x16xf32, #tpu.memory_space<vmem>>, %arg1: memref<2x16xf32, #tpu.memory_space<vmem>>) attributes {dimension_semantics = [], scalar_prefetch = 0 : i64, scratch_operands = 0 : i64, tpu.core_type = #tpu.core_type<tc>} {
    %c0 = arith.constant 0 : index
    %c0_0 = arith.constant 0 : index
    %c0_1 = arith.constant 0 : index
    %c0_2 = arith.constant 0 : index
    %0 = vector.load %arg0[%c0, %c0_0, %c0_1, %c0_2] : memref<2x4x16x16xf32, #tpu.memory_space<vmem>>, vector<2x4x16x16xf32>
    %cst = arith.constant dense<0xFF800000> : vector<2x16x16xf32>
    %1 = vector.multi_reduction <maximumf>, %0, %cst [1] : vector<2x4x16x16xf32> to vector<2x16x16xf32>
    %cst_3 = arith.constant dense<0xFF800000> : vector<2x16xf32>
    %2 = vector.multi_reduction <maximumf>, %1, %cst_3 [2] : vector<2x16x16xf32> to vector<2x16xf32>
    %3 = arith.addf %2, %2 : vector<2x16xf32>
    %c0_4 = arith.constant 0 : index
    %c0_5 = arith.constant 0 : index
    %4 = vector.load %arg1[%c0_4, %c0_5] : memref<2x16xf32, #tpu.memory_space<vmem>>, vector<2x16xf32>
    tpu.vector_store %arg1[%c0_4, %c0_5], %3 {strides = array<i32>} : memref<2x16xf32, #tpu.memory_space<vmem>>, vector<2x16xf32>,
    return
  }
}

</mosaic_0001>

<bundles_post_ra>
// kernel: tpu_custom_call.1
= control target key start
LH: loop header
LB: loop body
LE: loop exit
PB: predicated region body
PF: predicated region fallthrough
CT: control target
= control target key end

     0   :  { %6 = vsyncpa [#allocation3], 0  ;;  %s218_s0 = inlined_call_operand.hbm [shape: f32[2,4,16,16], index: 0, kind: input, shape index: {}]   ;;  %s219_s1 = inlined_call_operand.hbm [shape: f32[2,16], index: 1, kind: output, shape index: {}]  }
   0x1   :  { %7 = vsyncpa [#allocation4], 0  ;;  %s178_s6 = smov [#allocation2]  }
   0x2   :  { %s13_s7 = sshll.u32 %s178_s6, 4  ;;  %s14_s7 = int_to_ptr.vmem [resolvable:$true] %s13_s7 }
   0x3   :  { %s142_s8 = scalar_lea.vmem %s14_s7, 2048  ;;  %p147_p1 = scmp.lt.s32.totalorder %s14_s7, %s14_s7 }
   0x4   :  { %p143_p0 = scmp.ne.s32.totalorder %s14_s7, %s142_s8  ;;  %p148_p2 = scmp.lt.s32.totalorder %s142_s8, %s142_s8 }
   0x6   :  { %p149_p3 = por %p148_p2, %p147_p1 }
   0x8   :  { %p150_p4 = pnand %p149_p3, %p143_p0 }
   0xa   :  { %153 = shalt.err (!%p150_p4)
}
   0xb   :  { %s179_s9 = smov 128   ;;  %s180_s10 = smov 8  }
   0xc   :  { %19 = dma.hbm_to_vmem [thread:$0]  %s218_s0, 2048, %s14_s7, [#allocation3], %s179_s9, %s179_s9, %s180_s10  }
   0xd   :  { %174 = dma.done.wait [#allocation3], 2048  }
   0xe   :  { %175 = vsyncadd [#allocation3], 4294965248  ;;  %vm39_vm0 = vcmask 130048   ;;  %v31_v0 = vld [vmem:[#allocation2 + $0x40] sm:$0xff]  ;;  %v33_v1 = vld [vmem:[#allocation2 + $0x50] sm:$0xff]  ;;  %v88_v48 = vlaneseq  ;;  %vm99_vm1 = vcmask 130112  }
   0xf   :  { %v35_v2 = vld [vmem:[#allocation2 + $0x60] sm:$0xff]  ;;  %v37_v3 = vld [vmem:[#allocation2 + $0x70] sm:$0xff]  ;;  %v54_v4 = vsel %vm39_vm0, %v31_v0, -inf  ;;  %v55_v5 = vsel %vm39_vm0, %v33_v1, -inf  ;;  %v32_v14 = vld [vmem:[#allocation2 + $0x48] sm:$0xff]  ;;  %s181_s0 = smov [#allocation5]  }
  0x10   :  { %v57_v6 = vsel %vm39_vm0, %v35_v2, -inf  ;;  %v23_v7 = vld [vmem:[#allocation2] sm:$0xff]  ;;  %v25_v8 = vld [vmem:[#allocation2 + $0x10] sm:$0xff]  ;;  %v56_v9 = vmax.f32 %v54_v4, %v55_v5  ;;  %v59_v15 = vsel %vm39_vm0, %v37_v3, -inf  ;;  %v34_v18 = vld [vmem:[#allocation2 + $0x58] sm:$0xff]  ;;  %v61_v21 = vsel %vm39_vm0, %v32_v14, -inf }
  0x11   :  { %v27_v10 = vld [vmem:[#allocation2 + $0x20] sm:$0xff]  ;;  %v29_v11 = vld [vmem:[#allocation2 + $0x30] sm:$0xff]  ;;  %v40_v12 = vsel %vm39_vm0, %v23_v7, -inf  ;;  %v41_v13 = vsel %vm39_vm0, %v25_v8, -inf  ;;  %v36_v19 = vld [vmem:[#allocation2 + $0x68] sm:$0xff]  ;;  %v62_v24 = vsel %vm39_vm0, %v34_v18, -inf }
  0x12   :  { %v42_v16 = vmax.f32 %v40_v12, %v41_v13  ;;  %v43_v17 = vsel %vm39_vm0, %v27_v10, -inf  ;;  %v38_v20 = vld [vmem:[#allocation2 + $0x78] sm:$0xff]  ;;  %v58_v22 = vmax.f32 %v56_v9, %v57_v6  ;;  %v45_v23 = vsel %vm39_vm0, %v29_v11, -inf  ;;  %v24_v26 = vld [vmem:[#allocation2 + $0x8] sm:$0xff]  ;;  %s121_s13 = sshll.u32 %s181_s0, 4  ;;  %s122_s13 = int_to_ptr.vmem [resolvable:$true] %s121_s13 }
  0x13   :  { %v64_v25 = vsel %vm39_vm0, %v36_v19, -inf  ;;  %v26_v27 = vld [vmem:[#allocation2 + $0x18] sm:$0xff]  ;;  %v28_v28 = vld [vmem:[#allocation2 + $0x28] sm:$0xff]  ;;  %v63_v30 = vmax.f32 %v61_v21, %v62_v24  ;;  %v47_v32 = vsel %vm39_vm0, %v24_v26, -inf  ;;  %v66_v35 = vsel %vm39_vm0, %v38_v20, -inf  ;;  %s154_s14 = scalar_lea.vmem %s122_s13, 32  ;;  %p159_p6 = scmp.lt.s32.totalorder %s122_s13, %s122_s13 }
  0x14   :  { %v44_v29 = vmax.f32 %v42_v16, %v43_v17  ;;  %v30_v31 = vld [vmem:[#allocation2 + $0x38] sm:$0xff]  ;;  %v48_v33 = vsel %vm39_vm0, %v26_v27, -inf  ;;  %v60_v34 = vmax.f32 %v58_v22, %v59_v15  ;;  %v50_v37 = vsel %vm39_vm0, %v28_v28, -inf  ;;  %p155_p5 = scmp.ne.s32.totalorder %s122_s13, %s154_s14  ;;  %p160_p7 = scmp.lt.s32.totalorder %s154_s14, %s154_s14 }
  0x15   :  { %v49_v36 = vmax.f32 %v47_v32, %v48_v33  ;;  %v65_v39 = vmax.f32 %v63_v30, %v64_v25  ;;  %v52_v40 = vsel %vm39_vm0, %v30_v31, -inf  ;;  %v89_v49 = vand.u32 127, %v88_v48 }
  0x16   :  { %v46_v38 = vmax.f32 %v44_v29, %v45_v23  ;;  %v74_v41 = vsel %vm39_vm0, %v60_v34, -inf  ;;  %v91_v50 = vshrl.u32 %v88_v48, 7  ;;  %vm110_vm2 = vcmask 1041409   ;;  %p161_p8 = por %p160_p7, %p159_p6 }
  0x17   :  { %v51_v42 = vmax.f32 %v49_v36, %v50_v37  ;;  %75 = vmax.xlane.f32.xlu1 %v74_v41  ;;  %v67_v44 = vmax.f32 %v65_v39, %v66_v35  ;;  %v94_v51 = vadd.s32 4294967288, %v89_v49  ;;  %vm113_vm3 = vcmask 123904  }
  0x18   :  { %v68_v43 = vsel %vm39_vm0, %v46_v38, -inf  ;;  %v92_v54 = vsub.s32 %v89_v49, %v91_v50  ;;  %p162_p9 = pnand %p161_p8, %p155_p5 }
  0x19   :  { %69 = vmax.xlane.f32.xlu0 %v68_v43  ;;  %v53_v45 = vmax.f32 %v51_v42, %v52_v40  ;;  %v77_v46 = vsel %vm39_vm0, %v67_v44, -inf  ;;  %v97_v56 = vsub.s32 %v94_v51, %v91_v50 }
  0x1b   :  { %v71_v47 = vsel %vm39_vm0, %v53_v45, -inf  ;;  %78 = vmax.xlane.f32.xlu1 %v77_v46 }
  0x1d   :  { %72 = vmax.xlane.f32.xlu0 %v71_v47 }
  0xa0   :  { %v76_v52 = vpop.xlane.xlu1 %75 }
  0xa1   :  { %v82_v55 = vadd.f32 %v76_v52, %v76_v52 }
  0xa2   :  { %v70_v53 = vpop.xlane.xlu0 %69 }
  0xa3   :  { %v80_v57 = vadd.f32 %v70_v53, %v70_v53  ;;  %v104_v62 = vrot.slane %v82_v55, %v92_v54 }
  0xa4   :  { %v79_v58 = vpop.xlane.xlu1 %78 }
  0xa5   :  { %v83_v59 = vadd.f32 %v79_v58, %v79_v58  ;;  %v93_v0 = vrot.slane %v80_v57, %v92_v54 }
  0xa6   :  { %v73_v60 = vpop.xlane.xlu0 %72 }
  0xa7   :  { %v81_v61 = vadd.f32 %v73_v60, %v73_v60  ;;  %v108_v63 = vrot.slane %v83_v59, %v97_v56 }
  0xa9   :  { %v98_v1 = vrot.slane %v81_v61, %v97_v56  ;;  %v109_v2 = vsel %vm99_vm1, %v108_v63, %v104_v62 }
  0xab   :  { %v100_v3 = vsel %vm99_vm1, %v98_v1, %v93_v0 }
  0xac   :  { %v111_v4 = vsel %vm110_vm2, %v109_v2, %v100_v3 }
  0xad   :  { %114 = vst.msk [vmem:[#allocation5] sm:$0x3] %vm113_vm3, %v111_v4 }
  0xae   :  { %165 = shalt.err (!%p162_p9)
}
  0xaf   :  { %124 = dma.vmem_to_hbm [thread:$0]  %s122_s13, 32, %s219_s1, [#allocation4]  }
  0xb0   :  { %176 = dma.done.wait [#allocation4], 32  }
  0xb1   :  { %177 = vsyncadd [#allocation4], 4294967264 }
  0xb2   :  { %128 = vsyncpa [#allocation3], 1 }
  0xb3   :  { %129 = vsyncpa [#allocation4], 1 }

</bundles_post_ra>
